<compile_context>
chip_gen: v7x
topology: tpu7x:2x2x1
jax: 0.10.0
libtpu: 0.0.40
codegen_flags: <defaults>
</compile_context>

<pallas_src>
import functools
import math

import jax
import jax.numpy as jnp
from jax.experimental import pallas as pl
from jax.experimental.pallas import tpu as pltpu

EPS = 1e-5  # PyTorch nn.LayerNorm default eps


def _layernorm(x, gamma, beta):
    mu = jnp.mean(x, axis=-1, keepdims=True)
    var = jnp.mean((x - mu) ** 2, axis=-1, keepdims=True)
    return (x - mu) * jax.lax.rsqrt(var + EPS) * gamma + beta


def seq_input_kernel(
    # per-row stream (tiled over the grid): [x_num(num_in), x_time, mask, cat_idx, 0-pad]
    slab_ref,
    # resident (pre-folded) parameters
    w_num_ref, t2v_w_ref, t2v_b_ref, t2v_lin_ref, ln_t_g_ref, ln_t_b_ref,
    w_time_ref, b_all_ref, ln_p_g_ref, ln_p_b_ref,
    cat_table_ref, seq_tiled_ref, pad_enc_ref,
    # fused output: [p (E lanes) | enc (E_enc lanes)]
    out_ref,
):
    T = slab_ref.shape[0]
    num_in, E = w_num_ref.shape
    vocab_p = cat_table_ref.shape[0]

    slab = slab_ref[...]                                      # [T, 8]
    xn = slab[:, 0:num_in]                                    # [T, num_in]
    xt = slab[:, num_in:num_in + 1]                           # [T, 1]
    m = slab[:, num_in + 1:num_in + 2]                        # [T, 1] in {0,1}
    ci = slab[:, num_in + 2:num_in + 3].astype(jnp.int32)     # [T, 1] cat index

    # --- numeric contribution: x_num @ (w_num @ Wp_num), K=4 via VPU FMAs -----
    num_contrib = xn[:, 0:1] * w_num_ref[0:1, :]              # [T, E]
    for k in range(1, num_in):
        num_contrib = num_contrib + xn[:, k:k + 1] * w_num_ref[k:k + 1, :]

    # --- categorical contribution: in-kernel gather via tiny one-hot matmul ---
    # (Squeezer(-1) semantics: the [*,1] index column is used as a flat index.)
    viota = jax.lax.broadcasted_iota(jnp.int32, (T, vocab_p), 1)
    onehot = (ci == viota).astype(jnp.float32)                # [T, vocab_p]
    cat_contrib = jnp.dot(onehot, cat_table_ref[...],
                          preferred_element_type=jnp.float32)  # [T, E]

    # --- datetime feature: Time2Vec -> LayerNorm -> ReLU -> folded Linear -----
    t2v_all = xt * t2v_w_ref[...] + t2v_b_ref[...]            # [T, E]
    # lane 0 is the linear term, the rest get sin(); resident constant mask
    t2v = jnp.where(t2v_lin_ref[...] > 0.5, t2v_all, jnp.sin(t2v_all))
    t2v = _layernorm(t2v, ln_t_g_ref[...], ln_t_b_ref[...])
    t2v = jnp.maximum(t2v, 0.0)
    time_contrib = jnp.dot(t2v, w_time_ref[...],
                           preferred_element_type=jnp.float32)  # [T, E]

    # --- fused projection + LayerNorm + ReLU, written into lanes [0:E] --------
    p = num_contrib + cat_contrib + time_contrib + b_all_ref[...]
    p = _layernorm(p, ln_p_g_ref[...], ln_p_b_ref[...])
    out_ref[:, 0:E] = jnp.maximum(p, 0.0)

    # --- sequence vs padding encoding, written into lanes [E:E+E_enc] ---------
    # seq_tiled_ref is seq_encoding tiled to TILE_N rows (TILE_N % S == 0).
    enc = seq_tiled_ref[...] * m + pad_enc_ref[...] * (1.0 - m)
    out_ref[:, E:] = enc


def _round_up(x, m):
    return ((x + m - 1) // m) * m


@functools.partial(jax.jit, static_argnames=("tile_rows",))
def sequential_input_layer(x_num, x_cat, x_time, mask, params, *, tile_rows=4096):
    """x_num: [B,S,num_in] f32, x_cat: [B,S,1] int, x_time: [B,S,1] f32, mask: [B,S] bool."""
    B, S, num_in = x_num.shape
    N = B * S
    E = params["w_num"].shape[1]
    E_enc = params["seq_encoding"].shape[1]
    vocab = params["emb_table"].shape[0]

    # ---- fold linear layers into the projection (once, outside the kernel) ----
    Wp = params["w_proj"]                                  # [3E, E]
    Wp_num, Wp_cat, Wp_time = Wp[:E], Wp[E:2 * E], Wp[2 * E:]
    w_num_proj = params["w_num"] @ Wp_num                  # [num_in, E]
    cat_table_proj = params["emb_table"] @ Wp_cat          # [vocab, E]
    w_time_proj = params["w_time"] @ Wp_time               # [E, E]
    b_all = (params["b_num"] @ Wp_num
             + params["b_time"] @ Wp_time
             + params["b_proj"])                           # [1, E]

    # pad vocab to a sublane multiple so the one-hot matmul has a clean K dim
    vocab_p = _round_up(vocab, 8)
    if vocab_p != vocab:
        cat_table_proj = jnp.pad(cat_table_proj, ((0, vocab_p - vocab), (0, 0)))

    # Time2Vec lane-0 selector (resident constant, replaces per-tile iota)
    t2v_lin_mask = jnp.zeros((1, E), jnp.float32).at[0, 0].set(1.0)

    # ---- pack all narrow per-row streams into one [N, 8] slab -----------------
    # Columns: x_num[0:num_in], x_time, mask, cat_idx (Squeezer(-1) on x_cat), 0-pad.
    slab_w = num_in + 3
    slab_w_pad = _round_up(slab_w, 8)
    slab = jnp.concatenate(
        [x_num.reshape(N, num_in).astype(jnp.float32),
         x_time.reshape(N, 1).astype(jnp.float32),
         mask.reshape(N, 1).astype(jnp.float32),
         x_cat.reshape(N, 1).astype(jnp.float32),
         jnp.zeros((N, slab_w_pad - slab_w), jnp.float32)],
        axis=1)                                            # [N, 8]

    # ---- row tiling ------------------------------------------------------------
    # TILE_N must be a multiple of 8 (sublanes) and of S (so the pre-tiled
    # seq_encoding table lines up with row % S). Per-tile VMEM at TILE_N=4096 is
    # ~2 MiB/buffer for the slab and ~2 MiB/buffer for the fused output (lane
    # padded to 128) -> ~8-9 MiB double-buffered; fits v5e's 16 MiB and v7x's
    # 32 MiB scoped defaults with headroom.
    base = (8 * S) // math.gcd(8, S)
    TILE_N = max(base, (min(tile_rows, _round_up(N, base)) // base) * base)
    Np = _round_up(N, TILE_N)
    # ensure >= 2 tiles when possible so "parallel" can split across v7x's 2 TCs
    if Np // TILE_N == 1 and TILE_N >= 2 * base:
        TILE_N = max(base, _round_up(TILE_N // 2, base))
        Np = _round_up(N, TILE_N)
    pad = Np - N
    if pad:
        slab = jnp.pad(slab, ((0, pad), (0, 0)))

    seq_tiled = jnp.tile(params["seq_encoding"], (TILE_N // S, 1))  # [TILE_N, E_enc]

    def row_spec(width):
        return pl.BlockSpec((TILE_N, width), lambda i: (i, 0))

    def const_spec(a):
        return pl.BlockSpec(a.shape, lambda i: (0, 0))

    param_args = (
        w_num_proj, params["t2v_w"], params["t2v_b"], t2v_lin_mask,
        params["ln_t_g"], params["ln_t_b"],
        w_time_proj, b_all, params["ln_p_g"], params["ln_p_b"],
        cat_table_proj, seq_tiled, params["pad_encoding"],
    )
    in_specs = [row_spec(slab_w_pad)] + [const_spec(a) for a in param_args]

    out_full = pl.pallas_call(
        seq_input_kernel,
        out_shape=jax.ShapeDtypeStruct((Np, E + E_enc), jnp.float32),
        grid=(Np // TILE_N,),
        in_specs=in_specs,
        out_specs=row_spec(E + E_enc),
        compiler_params=pltpu.CompilerParams(
            dimension_semantics=("parallel",),
            vmem_limit_bytes=32 * 1024 * 1024),
    )(slab, *param_args)

    return out_full[:N].reshape(B, S, E + E_enc)


def reference(x_num, x_cat, x_time, mask, params):
    """Pure-JAX mirror of the original PyTorch forward, for verification."""
    e_num = x_num @ params["w_num"] + params["b_num"]
    e_cat = params["emb_table"][x_cat[..., 0]]            # Squeezer(-1) + Embedding
    w, b = params["t2v_w"], params["t2v_b"]
    lin = w[:, 0] * x_time + b[:, 0]
    per = jnp.sin(w[:, 1:] * x_time + b[:, 1:])
    t2v = jnp.concatenate([lin, per], axis=-1)
    mu = t2v.mean(-1, keepdims=True)
    var = ((t2v - mu) ** 2).mean(-1, keepdims=True)
    t2v = (t2v - mu) / jnp.sqrt(var + EPS) * params["ln_t_g"] + params["ln_t_b"]
    t2v = jnp.maximum(t2v, 0.0)
    e_time = t2v @ params["w_time"] + params["b_time"]
    h = jnp.concatenate([e_num, e_cat, e_time], axis=-1)
    p = h @ params["w_proj"] + params["b_proj"]
    mu = p.mean(-1, keepdims=True)
    var = ((p - mu) ** 2).mean(-1, keepdims=True)
    p = (p - mu) / jnp.sqrt(var + EPS) * params["ln_p_g"] + params["ln_p_b"]
    p = jnp.maximum(p, 0.0)
    mf = mask[..., None].astype(jnp.float32)
    enc = params["seq_encoding"][None] * mf + params["pad_encoding"] * (1.0 - mf)
    return jnp.concatenate([p, enc], axis=-1)


if __name__ == "__main__":
    B, S = 2, 8            # batch, sequence length
    E = 32                 # embedding_size
    E_enc = 16             # sequence_encoding_size -> (S, E_enc)
    num_in = 4             # numeric feature input width
    vocab = 7              # categorical vocabulary size

    key = jax.random.PRNGKey(0)
    keys = jax.random.split(key, 16)

    def u(k, shape, scale=0.5):
        return jax.random.uniform(k, shape, jnp.float32, -scale, scale)

    # deterministic synthetic parameters; weights stored [in, out]
    # (transposed vs PyTorch nn.Linear storage).
    params = dict(
        w_num=u(keys[0], (num_in, E)), b_num=u(keys[1], (1, E)),
        emb_table=u(keys[2], (vocab, E)),
        t2v_w=u(keys[3], (1, E)), t2v_b=u(keys[4], (1, E)),
        ln_t_g=jnp.ones((1, E), jnp.float32), ln_t_b=jnp.zeros((1, E), jnp.float32),
        w_time=u(keys[5], (E, E)), b_time=u(keys[6], (1, E)),
        w_proj=u(keys[7], (3 * E, E)), b_proj=u(keys[8], (1, E)),
        ln_p_g=jnp.ones((1, E), jnp.float32), ln_p_b=jnp.zeros((1, E), jnp.float32),
        seq_encoding=u(keys[9], (S, E_enc)),
        pad_encoding=u(keys[10], (1, E_enc)),
    )

    x_num = jax.random.normal(keys[11], (B, S, num_in), jnp.float32)
    x_cat = jax.random.randint(keys[12], (B, S, 1), 0, vocab)
    x_time = jax.random.normal(keys[13], (B, S, 1), jnp.float32)
    mask = jax.random.bernoulli(keys[14], 0.7, (B, S))

    out = sequential_input_layer(x_num, x_cat, x_time, mask, params)
    out = jax.block_until_ready(out)

    ref = reference(x_num, x_cat, x_time, mask, params)
    assert out.shape == (B, S, E + E_enc), out.shape
    assert jnp.allclose(out, ref, atol=1e-3, rtol=1e-3), "mismatch vs pure-JAX reference"
    print("KERNEL_OK")
</pallas_src>

<mosaic_0001>
module attributes {stable_mosaic.version = 11 : i64} {
  func.func @seq_input_kernel(%arg0: i32, %arg1: memref<8x8xf32, #tpu.memory_space<vmem>>, %arg2: memref<4x32xf32, #tpu.memory_space<vmem>>, %arg3: memref<1x32xf32, #tpu.memory_space<vmem>>, %arg4: memref<1x32xf32, #tpu.memory_space<vmem>>, %arg5: memref<1x32xf32, #tpu.memory_space<vmem>>, %arg6: memref<1x32xf32, #tpu.memory_space<vmem>>, %arg7: memref<1x32xf32, #tpu.memory_space<vmem>>, %arg8: memref<32x32xf32, #tpu.memory_space<vmem>>, %arg9: memref<1x32xf32, #tpu.memory_space<vmem>>, %arg10: memref<1x32xf32, #tpu.memory_space<vmem>>, %arg11: memref<1x32xf32, #tpu.memory_space<vmem>>, %arg12: memref<8x32xf32, #tpu.memory_space<vmem>>, %arg13: memref<8x16xf32, #tpu.memory_space<vmem>>, %arg14: memref<1x16xf32, #tpu.memory_space<vmem>>, %arg15: memref<8x48xf32, #tpu.memory_space<vmem>>) attributes {dimension_semantics = [#tpu.dimension_semantics<parallel>], iteration_bounds = array<i64: 2>, scalar_prefetch = 0 : i64, scratch_operands = 0 : i64, tpu.core_type = #tpu.core_type<tc>, window_params = [{transform_indices = @transform_0, window_bounds = array<i64: 8, 8>}, {pipeline_mode = #tpu.pipeline_mode<synchronous>, transform_indices = @transform_1, window_bounds = array<i64: 4, 32>}, {pipeline_mode = #tpu.pipeline_mode<synchronous>, transform_indices = @transform_2, window_bounds = array<i64: 1, 32>}, {pipeline_mode = #tpu.pipeline_mode<synchronous>, transform_indices = @transform_3, window_bounds = array<i64: 1, 32>}, {pipeline_mode = #tpu.pipeline_mode<synchronous>, transform_indices = @transform_4, window_bounds = array<i64: 1, 32>}, {pipeline_mode = #tpu.pipeline_mode<synchronous>, transform_indices = @transform_5, window_bounds = array<i64: 1, 32>}, {pipeline_mode = #tpu.pipeline_mode<synchronous>, transform_indices = @transform_6, window_bounds = array<i64: 1, 32>}, {pipeline_mode = #tpu.pipeline_mode<synchronous>, transform_indices = @transform_7, window_bounds = array<i64: 32, 32>}, {pipeline_mode = #tpu.pipeline_mode<synchronous>, transform_indices = @transform_8, window_bounds = array<i64: 1, 32>}, {pipeline_mode = #tpu.pipeline_mode<synchronous>, transform_indices = @transform_9, window_bounds = array<i64: 1, 32>}, {pipeline_mode = #tpu.pipeline_mode<synchronous>, transform_indices = @transform_10, window_bounds = array<i64: 1, 32>}, {pipeline_mode = #tpu.pipeline_mode<synchronous>, transform_indices = @transform_11, window_bounds = array<i64: 8, 32>}, {pipeline_mode = #tpu.pipeline_mode<synchronous>, transform_indices = @transform_12, window_bounds = array<i64: 8, 16>}, {pipeline_mode = #tpu.pipeline_mode<synchronous>, transform_indices = @transform_13, window_bounds = array<i64: 1, 16>}, {transform_indices = @transform_14, window_bounds = array<i64: 8, 48>}]} {
    %c0 = arith.constant 0 : index
    %c0_0 = arith.constant 0 : index
    %0 = vector.load %arg1[%c0, %c0_0] : memref<8x8xf32, #tpu.memory_space<vmem>>, vector<8x8xf32>
    %1 = vector.extract_strided_slice %0 {offsets = [0, 0], sizes = [8, 4], strides = [1, 1]} : vector<8x8xf32> to vector<8x4xf32>
    %2 = vector.extract_strided_slice %0 {offsets = [0, 4], sizes = [8, 1], strides = [1, 1]} : vector<8x8xf32> to vector<8x1xf32>
    %3 = vector.extract_strided_slice %0 {offsets = [0, 5], sizes = [8, 1], strides = [1, 1]} : vector<8x8xf32> to vector<8x1xf32>
    %4 = vector.extract_strided_slice %0 {offsets = [0, 6], sizes = [8, 1], strides = [1, 1]} : vector<8x8xf32> to vector<8x1xf32>
    %5 = arith.fptosi %4 : vector<8x1xf32> to vector<8x1xi32>
    %6 = vector.extract_strided_slice %1 {offsets = [0, 0], sizes = [8, 1], strides = [1, 1]} : vector<8x4xf32> to vector<8x1xf32>
    %c0_1 = arith.constant 0 : index
    %c0_2 = arith.constant 0 : index
    %7 = vector.load %arg2[%c0_1, %c0_2] : memref<4x32xf32, #tpu.memory_space<vmem>>, vector<1x32xf32>
    %8 = vector.broadcast %6 : vector<8x1xf32> to vector<8x32xf32>
    %9 = vector.broadcast %7 : vector<1x32xf32> to vector<8x32xf32>
    %10 = arith.mulf %8, %9 : vector<8x32xf32>
    %11 = vector.extract_strided_slice %1 {offsets = [0, 1], sizes = [8, 1], strides = [1, 1]} : vector<8x4xf32> to vector<8x1xf32>
    %c1 = arith.constant 1 : index
    %c0_3 = arith.constant 0 : index
    %12 = vector.load %arg2[%c1, %c0_3] : memref<4x32xf32, #tpu.memory_space<vmem>>, vector<1x32xf32>
    %13 = vector.broadcast %11 : vector<8x1xf32> to vector<8x32xf32>
    %14 = vector.broadcast %12 : vector<1x32xf32> to vector<8x32xf32>
    %15 = arith.mulf %13, %14 : vector<8x32xf32>
    %16 = arith.addf %10, %15 : vector<8x32xf32>
    %17 = vector.extract_strided_slice %1 {offsets = [0, 2], sizes = [8, 1], strides = [1, 1]} : vector<8x4xf32> to vector<8x1xf32>
    %c2 = arith.constant 2 : index
    %c0_4 = arith.constant 0 : index
    %18 = vector.load %arg2[%c2, %c0_4] : memref<4x32xf32, #tpu.memory_space<vmem>>, vector<1x32xf32>
    %19 = vector.broadcast %17 : vector<8x1xf32> to vector<8x32xf32>
    %20 = vector.broadcast %18 : vector<1x32xf32> to vector<8x32xf32>
    %21 = arith.mulf %19, %20 : vector<8x32xf32>
    %22 = arith.addf %16, %21 : vector<8x32xf32>
    %23 = vector.extract_strided_slice %1 {offsets = [0, 3], sizes = [8, 1], strides = [1, 1]} : vector<8x4xf32> to vector<8x1xf32>
    %c3 = arith.constant 3 : index
    %c0_5 = arith.constant 0 : index
    %24 = vector.load %arg2[%c3, %c0_5] : memref<4x32xf32, #tpu.memory_space<vmem>>, vector<1x32xf32>
    %25 = vector.broadcast %23 : vector<8x1xf32> to vector<8x32xf32>
    %26 = vector.broadcast %24 : vector<1x32xf32> to vector<8x32xf32>
    %27 = arith.mulf %25, %26 : vector<8x32xf32>
    %28 = arith.addf %22, %27 : vector<8x32xf32>
    %29 = tpu.iota {dimensions = array<i32: 1>} : vector<8x8xi32>
    %30 = vector.broadcast %5 : vector<8x1xi32> to vector<8x8xi32>
    %31 = arith.cmpi eq, %30, %29 : vector<8x8xi32>
    %32 = arith.extui %31 : vector<8x8xi1> to vector<8x8xi32>
    %33 = arith.sitofp %32 : vector<8x8xi32> to vector<8x8xf32>
    %c0_6 = arith.constant 0 : index
    %c0_7 = arith.constant 0 : index
    %34 = vector.load %arg12[%c0_6, %c0_7] : memref<8x32xf32, #tpu.memory_space<vmem>>, vector<8x32xf32>
    %cst = arith.constant dense<0.000000e+00> : vector<8x32xf32>
    %35 = tpu.matmul %33, %34, %cst {dimension_numbers = #tpu.dot_dimension_numbers<[1], [0], [0], [1], [0, 0, 1, 1], [], []>} : vector<8x8xf32>, vector<8x32xf32>, vector<8x32xf32> -> vector<8x32xf32>
    %c0_8 = arith.constant 0 : index
    %c0_9 = arith.constant 0 : index
    %36 = vector.load %arg3[%c0_8, %c0_9] : memref<1x32xf32, #tpu.memory_space<vmem>>, vector<1x32xf32>
    %37 = vector.broadcast %2 : vector<8x1xf32> to vector<8x32xf32>
    %38 = vector.broadcast %36 : vector<1x32xf32> to vector<8x32xf32>
    %39 = arith.mulf %37, %38 : vector<8x32xf32>
    %c0_10 = arith.constant 0 : index
    %c0_11 = arith.constant 0 : index
    %40 = vector.load %arg4[%c0_10, %c0_11] : memref<1x32xf32, #tpu.memory_space<vmem>>, vector<1x32xf32>
    %41 = vector.broadcast %40 : vector<1x32xf32> to vector<8x32xf32>
    %42 = arith.addf %39, %41 : vector<8x32xf32>
    %c0_12 = arith.constant 0 : index
    %c0_13 = arith.constant 0 : index
    %43 = vector.load %arg5[%c0_12, %c0_13] : memref<1x32xf32, #tpu.memory_space<vmem>>, vector<1x32xf32>
    %cst_14 = arith.constant 5.000000e-01 : f32
    %44 = vector.broadcast %cst_14 : f32 to vector<1x32xf32>
    %45 = arith.cmpf ogt, %43, %44 : vector<1x32xf32>
    %46 = math.sin %42 : vector<8x32xf32>
    %47 = vector.shape_cast %45 : vector<1x32xi1> to vector<1x32xi1>
    %48 = vector.broadcast %47 : vector<1x32xi1> to vector<8x32xi1>
    %49 = arith.select %48, %42, %46 : vector<8x32xi1>, vector<8x32xf32>
    %c0_15 = arith.constant 0 : index
    %c0_16 = arith.constant 0 : index
    %50 = vector.load %arg6[%c0_15, %c0_16] : memref<1x32xf32, #tpu.memory_space<vmem>>, vector<1x32xf32>
    %c0_17 = arith.constant 0 : index
    %c0_18 = arith.constant 0 : index
    %51 = vector.load %arg7[%c0_17, %c0_18] : memref<1x32xf32, #tpu.memory_space<vmem>>, vector<1x32xf32>
    %cst_19 = arith.constant dense<0.000000e+00> : vector<8xf32>
    %52 = vector.multi_reduction <add>, %49, %cst_19 [1] : vector<8x32xf32> to vector<8xf32>
    %53 = vector.shape_cast %52 : vector<8xf32> to vector<8x1xf32>
    %cst_20 = arith.constant 3.200000e+01 : f32
    %54 = vector.broadcast %cst_20 : f32 to vector<8x1xf32>
    %55 = arith.divf %53, %54 : vector<8x1xf32>
    %56 = vector.broadcast %55 : vector<8x1xf32> to vector<8x32xf32>
    %57 = arith.subf %49, %56 : vector<8x32xf32>
    %58 = arith.mulf %57, %57 : vector<8x32xf32>
    %cst_21 = arith.constant dense<0.000000e+00> : vector<8xf32>
    %59 = vector.multi_reduction <add>, %58, %cst_21 [1] : vector<8x32xf32> to vector<8xf32>
    %60 = vector.shape_cast %59 : vector<8xf32> to vector<8x1xf32>
    %cst_22 = arith.constant 3.200000e+01 : f32
    %61 = vector.broadcast %cst_22 : f32 to vector<8x1xf32>
    %62 = arith.divf %60, %61 : vector<8x1xf32>
    %63 = vector.broadcast %55 : vector<8x1xf32> to vector<8x32xf32>
    %64 = arith.subf %49, %63 : vector<8x32xf32>
    %cst_23 = arith.constant 9.99999974E-6 : f32
    %65 = vector.broadcast %cst_23 : f32 to vector<8x1xf32>
    %66 = arith.addf %62, %65 : vector<8x1xf32>
    %67 = math.rsqrt %66 : vector<8x1xf32>
    %68 = vector.broadcast %67 : vector<8x1xf32> to vector<8x32xf32>
    %69 = arith.mulf %64, %68 : vector<8x32xf32>
    %70 = vector.broadcast %50 : vector<1x32xf32> to vector<8x32xf32>
    %71 = arith.mulf %69, %70 : vector<8x32xf32>
    %72 = vector.broadcast %51 : vector<1x32xf32> to vector<8x32xf32>
    %73 = arith.addf %71, %72 : vector<8x32xf32>
    %cst_24 = arith.constant 0.000000e+00 : f32
    %74 = vector.broadcast %cst_24 : f32 to vector<8x32xf32>
    %75 = arith.maximumf %73, %74 : vector<8x32xf32>
    %c0_25 = arith.constant 0 : index
    %c0_26 = arith.constant 0 : index
    %76 = vector.load %arg8[%c0_25, %c0_26] : memref<32x32xf32, #tpu.memory_space<vmem>>, vector<32x32xf32>
    %cst_27 = arith.constant dense<0.000000e+00> : vector<8x32xf32>
    %77 = tpu.matmul %75, %76, %cst_27 {dimension_numbers = #tpu.dot_dimension_numbers<[1], [0], [0], [1], [0, 0, 1, 1], [], []>} : vector<8x32xf32>, vector<32x32xf32>, vector<8x32xf32> -> vector<8x32xf32>
    %78 = arith.addf %28, %35 : vector<8x32xf32>
    %79 = arith.addf %78, %77 : vector<8x32xf32>
    %c0_28 = arith.constant 0 : index
    %c0_29 = arith.constant 0 : index
    %80 = vector.load %arg9[%c0_28, %c0_29] : memref<1x32xf32, #tpu.memory_space<vmem>>, vector<1x32xf32>
    %81 = vector.broadcast %80 : vector<1x32xf32> to vector<8x32xf32>
    %82 = arith.addf %79, %81 : vector<8x32xf32>
    %c0_30 = arith.constant 0 : index
    %c0_31 = arith.constant 0 : index
    %83 = vector.load %arg10[%c0_30, %c0_31] : memref<1x32xf32, #tpu.memory_space<vmem>>, vector<1x32xf32>
    %c0_32 = arith.constant 0 : index
    %c0_33 = arith.constant 0 : index
    %84 = vector.load %arg11[%c0_32, %c0_33] : memref<1x32xf32, #tpu.memory_space<vmem>>, vector<1x32xf32>
    %cst_34 = arith.constant dense<0.000000e+00> : vector<8xf32>
    %85 = vector.multi_reduction <add>, %82, %cst_34 [1] : vector<8x32xf32> to vector<8xf32>
    %86 = vector.shape_cast %85 : vector<8xf32> to vector<8x1xf32>
    %cst_35 = arith.constant 3.200000e+01 : f32
    %87 = vector.broadcast %cst_35 : f32 to vector<8x1xf32>
    %88 = arith.divf %86, %87 : vector<8x1xf32>
    %89 = vector.broadcast %88 : vector<8x1xf32> to vector<8x32xf32>
    %90 = arith.subf %82, %89 : vector<8x32xf32>
    %91 = arith.mulf %90, %90 : vector<8x32xf32>
    %cst_36 = arith.constant dense<0.000000e+00> : vector<8xf32>
    %92 = vector.multi_reduction <add>, %91, %cst_36 [1] : vector<8x32xf32> to vector<8xf32>
    %93 = vector.shape_cast %92 : vector<8xf32> to vector<8x1xf32>
    %cst_37 = arith.constant 3.200000e+01 : f32
    %94 = vector.broadcast %cst_37 : f32 to vector<8x1xf32>
    %95 = arith.divf %93, %94 : vector<8x1xf32>
    %96 = vector.broadcast %88 : vector<8x1xf32> to vector<8x32xf32>
    %97 = arith.subf %82, %96 : vector<8x32xf32>
    %cst_38 = arith.constant 9.99999974E-6 : f32
    %98 = vector.broadcast %cst_38 : f32 to vector<8x1xf32>
    %99 = arith.addf %95, %98 : vector<8x1xf32>
    %100 = math.rsqrt %99 : vector<8x1xf32>
    %101 = vector.broadcast %100 : vector<8x1xf32> to vector<8x32xf32>
    %102 = arith.mulf %97, %101 : vector<8x32xf32>
    %103 = vector.broadcast %83 : vector<1x32xf32> to vector<8x32xf32>
    %104 = arith.mulf %102, %103 : vector<8x32xf32>
    %105 = vector.broadcast %84 : vector<1x32xf32> to vector<8x32xf32>
    %106 = arith.addf %104, %105 : vector<8x32xf32>
    %cst_39 = arith.constant 0.000000e+00 : f32
    %107 = vector.broadcast %cst_39 : f32 to vector<8x32xf32>
    %108 = arith.maximumf %106, %107 : vector<8x32xf32>
    %c0_40 = arith.constant 0 : index
    %c0_41 = arith.constant 0 : index
    %109 = vector.load %arg15[%c0_40, %c0_41] : memref<8x48xf32, #tpu.memory_space<vmem>>, vector<8x32xf32>
    tpu.vector_store %arg15[%c0_40, %c0_41], %108 {strides = array<i32>} : memref<8x48xf32, #tpu.memory_space<vmem>>, vector<8x32xf32>,
    %c0_42 = arith.constant 0 : index
    %c0_43 = arith.constant 0 : index
    %110 = vector.load %arg13[%c0_42, %c0_43] : memref<8x16xf32, #tpu.memory_space<vmem>>, vector<8x16xf32>
    %111 = vector.broadcast %3 : vector<8x1xf32> to vector<8x16xf32>
    %112 = arith.mulf %110, %111 : vector<8x16xf32>
    %c0_44 = arith.constant 0 : index
    %c0_45 = arith.constant 0 : index
    %113 = vector.load %arg14[%c0_44, %c0_45] : memref<1x16xf32, #tpu.memory_space<vmem>>, vector<1x16xf32>
    %cst_46 = arith.constant 1.000000e+00 : f32
    %114 = vector.broadcast %cst_46 : f32 to vector<8x1xf32>
    %115 = arith.subf %114, %3 : vector<8x1xf32>
    %116 = vector.broadcast %113 : vector<1x16xf32> to vector<8x16xf32>
    %117 = vector.broadcast %115 : vector<8x1xf32> to vector<8x16xf32>
    %118 = arith.mulf %116, %117 : vector<8x16xf32>
    %119 = arith.addf %112, %118 : vector<8x16xf32>
    %c0_47 = arith.constant 0 : index
    %c32 = arith.constant 32 : index
    %120 = vector.load %arg15[%c0_47, %c32] : memref<8x48xf32, #tpu.memory_space<vmem>>, vector<8x16xf32>
    tpu.vector_store %arg15[%c0_47, %c32], %119 {strides = array<i32>} : memref<8x48xf32, #tpu.memory_space<vmem>>, vector<8x16xf32>,
    return
  }
  func.func @transform_0(%arg0: i32) -> (i32, i32) {
    %c0_i32 = arith.constant 0 : i32
    %c0_i32_0 = arith.constant 0 : i32
    return %arg0, %c0_i32 : i32, i32
  }
  func.func @transform_1(%arg0: i32) -> (i32, i32) {
    %c0_i32 = arith.constant 0 : i32
    %c0_i32_0 = arith.constant 0 : i32
    %c0_i32_1 = arith.constant 0 : i32
    return %c0_i32, %c0_i32_0 : i32, i32
  }
  func.func @transform_2(%arg0: i32) -> (i32, i32) {
    %c0_i32 = arith.constant 0 : i32
    %c0_i32_0 = arith.constant 0 : i32
    %c0_i32_1 = arith.constant 0 : i32
    return %c0_i32, %c0_i32_0 : i32, i32
  }
  func.func @transform_3(%arg0: i32) -> (i32, i32) {
    %c0_i32 = arith.constant 0 : i32
    %c0_i32_0 = arith.constant 0 : i32
    %c0_i32_1 = arith.constant 0 : i32
    return %c0_i32, %c0_i32_0 : i32, i32
  }
  func.func @transform_4(%arg0: i32) -> (i32, i32) {
    %c0_i32 = arith.constant 0 : i32
    %c0_i32_0 = arith.constant 0 : i32
    %c0_i32_1 = arith.constant 0 : i32
    return %c0_i32, %c0_i32_0 : i32, i32
  }
  func.func @transform_5(%arg0: i32) -> (i32, i32) {
    %c0_i32 = arith.constant 0 : i32
    %c0_i32_0 = arith.constant 0 : i32
    %c0_i32_1 = arith.constant 0 : i32
    return %c0_i32, %c0_i32_0 : i32, i32
  }
  func.func @transform_6(%arg0: i32) -> (i32, i32) {
    %c0_i32 = arith.constant 0 : i32
    %c0_i32_0 = arith.constant 0 : i32
    %c0_i32_1 = arith.constant 0 : i32
    return %c0_i32, %c0_i32_0 : i32, i32
  }
  func.func @transform_7(%arg0: i32) -> (i32, i32) {
    %c0_i32 = arith.constant 0 : i32
    %c0_i32_0 = arith.constant 0 : i32
    %c0_i32_1 = arith.constant 0 : i32
    return %c0_i32, %c0_i32_0 : i32, i32
  }
  func.func @transform_8(%arg0: i32) -> (i32, i32) {
    %c0_i32 = arith.constant 0 : i32
    %c0_i32_0 = arith.constant 0 : i32
    %c0_i32_1 = arith.constant 0 : i32
    return %c0_i32, %c0_i32_0 : i32, i32
  }
  func.func @transform_9(%arg0: i32) -> (i32, i32) {
    %c0_i32 = arith.constant 0 : i32
    %c0_i32_0 = arith.constant 0 : i32
    %c0_i32_1 = arith.constant 0 : i32
    return %c0_i32, %c0_i32_0 : i32, i32
  }
  func.func @transform_10(%arg0: i32) -> (i32, i32) {
    %c0_i32 = arith.constant 0 : i32
    %c0_i32_0 = arith.constant 0 : i32
    %c0_i32_1 = arith.constant 0 : i32
    return %c0_i32, %c0_i32_0 : i32, i32
  }
  func.func @transform_11(%arg0: i32) -> (i32, i32) {
    %c0_i32 = arith.constant 0 : i32
    %c0_i32_0 = arith.constant 0 : i32
    %c0_i32_1 = arith.constant 0 : i32
    return %c0_i32, %c0_i32_0 : i32, i32
  }
  func.func @transform_12(%arg0: i32) -> (i32, i32) {
    %c0_i32 = arith.constant 0 : i32
    %c0_i32_0 = arith.constant 0 : i32
    %c0_i32_1 = arith.constant 0 : i32
    return %c0_i32, %c0_i32_0 : i32, i32
  }
  func.func @transform_13(%arg0: i32) -> (i32, i32) {
    %c0_i32 = arith.constant 0 : i32
    %c0_i32_0 = arith.constant 0 : i32
    %c0_i32_1 = arith.constant 0 : i32
    return %c0_i32, %c0_i32_0 : i32, i32
  }
  func.func @transform_14(%arg0: i32) -> (i32, i32) {
    %c0_i32 = arith.constant 0 : i32
    %c0_i32_0 = arith.constant 0 : i32
    return %arg0, %c0_i32 : i32, i32
  }
}

</mosaic_0001>

<bundles_post_ra>
// kernel: sequential_input_layer.1
= control target key start
LH: loop header
LB: loop body
LE: loop exit
PB: predicated region body
PF: predicated region fallthrough
CT: control target
= control target key end

     0   :  { %s1465_s0 = inlined_call_operand.vmem [shape: f32[16,8], index: 0, kind: input, shape index: {}]   ;;  %s1466_s1 = inlined_call_operand.vmem [shape: f32[4,32], index: 1, kind: input, shape index: {}]   ;;  %s1467_s2 = inlined_call_operand.vmem [shape: f32[1,32], index: 2, kind: input, shape index: {}]   ;;  %s1468_s3 = inlined_call_operand.vmem [shape: f32[1,32], index: 3, kind: input, shape index: {}]   ;;  %s1469_s4 = inlined_call_operand.vmem [shape: f32[1,32], index: 4, kind: input, shape index: {}]   ;;  %s1470_s5 = inlined_call_operand.vmem [shape: f32[1,32], index: 5, kind: input, shape index: {}]   ;;  %s1471_s6 = inlined_call_operand.vmem [shape: f32[1,32], index: 6, kind: input, shape index: {}]   ;;  %s1472_s7 = inlined_call_operand.vmem [shape: f32[32,32], index: 7, kind: input, shape index: {}]   ;;  %s1473_s8 = inlined_call_operand.vmem [shape: f32[1,32], index: 8, kind: input, shape index: {}]   ;;  %s1474_s9 = inlined_call_operand.vmem [shape: f32[1,32], index: 9, kind: input, shape index: {}]   ;;  %s1475_s10 = inlined_call_operand.vmem [shape: f32[1,32], index: 10, kind: input, shape index: {}]   ;;  %s1476_s11 = inlined_call_operand.vmem [shape: f32[8,32], index: 11, kind: input, shape index: {}]   ;;  %s1477_s12 = inlined_call_operand.vmem [shape: f32[8,16], index: 12, kind: input, shape index: {}]   ;;  %s1478_s13 = inlined_call_operand.vmem [shape: f32[1,16], index: 13, kind: input, shape index: {}]   ;;  %s1479_s14 = inlined_call_operand.hbm [shape: f32[16,48], index: 14, kind: output, shape index: {}]  }
   0x1   :  { %1481 = sst [smem:[#allocation7_spill]] %s1465_s0 }
   0x2   :  { %1482 = sst [smem:[#allocation8_spill]] %s1466_s1 }
   0x3   :  { %1483 = sst [smem:[#allocation9_spill]] %s1467_s2 }
   0x4   :  { %19 = vsyncpa [#allocation3], 0 }
   0x5   :  { %21 = vsyncpa [#allocation3 + $0x1], 0  ;;  %s1268_s29 = smov 0   ;;  %s1270_s30 = smov 0  }
   0x6   :  { %s1272_s15 = smov 0   ;;  %s1274_s16 = smov 0  }
   0x7 LB: > { %1484 = sst [smem:[#allocation5_spill]] %s1169_s15  ;;  %s1289_s17 = sadd.s32 4294967295, %s1173_s16   ;;  %s1173_s16 = sphi %s1274_s16, %s1495_s16   ;;  %s1169_s15 = sphi %s1272_s15, %s1492_s15   ;;  %s1165_s30 = sphi %s1270_s30, %s1494_s30   ;;  %s1161_s29 = sphi %s1268_s29, %s1493_s29  }
   0x8   : > { %s975_s18 = sadd.s32 4294967294, %s1173_s16   ;;  %s1293_s19 = sadd.s32 1, %s1173_s16  }
   0x9   : > { %s333_s20 = sadd.s32 1, %s1169_s15  ;;  %s330_s21 = ssub.s32 %s1173_s16, %s1293_s19 }
   0xa   : > { %p343_p0 = scmp.ne.s32.totalorder %s1169_s15, %s1165_s30  ;;  %p331_p1 = scmp.eq.s32.totalorder %s330_s21, 0 }
   0xb   : > { %p344_p2 = scmp.eq.s32.totalorder %s1289_s17, 1  ;;  %p349_p3 = scmp.ne.s32.totalorder %s1165_s30, %s1161_s29 }
   0xc   : > { %p350_p4 = scmp.eq.s32.totalorder %s975_s18, 1  ;;  %p978_p7 = scmp.ge.s32.totalorder %s1173_s16, 1 }
   0xd   : > { %s1304_s22 = scalar_select %p331_p1, %s1169_s15, %s333_s20  }
   0xe   : > { %p1306_p5 = por %p344_p2, %p343_p0  ;;  %p1310_p6 = por %p350_p4, %p349_p3 }
   0xf   : > { %1485 = sst [smem:[#allocation6_spill]] %s1304_s22  ;;  %p414_p8 = scmp.lt.s32.totalorder %s1173_s16, 3 }
  0x11   : > { %p415_p9 = pnand %p978_p7, %p414_p8 }
  0x12   : > { %p459_p10 = scmp.lt.s32.totalorder (!%p415_p9), %s1289_s17, 1  ;;  %v1175_v0 = vmov (!%p415_p9), 4   ;;  %s1488_s0 = sld [smem:[#allocation7_spill]] (!%p415_p9)  ;;  %v988_v3 = vld [vmem:[%s1468_s3] ss:$0 sm:$0xff] (!%p415_p9)  ;;  %vm727_vm15 = vcmask (!%p415_p9), 261120  }
  0x13   : > { %418 = sbr.rel (%p415_p9) target bundleno = 1104 (0x450), region = 76  ;;  %1095 = vset.pattern.permute.xlu0 (!%p415_p9), %v1175_v0  ;;  %s1489_s2 = sld [smem:[#allocation9_spill]] (!%p415_p9)  ;;  %v1176_v17 = vmov (!%p415_p9), 683565275   ;;  %v1177_v19 = vmov (!%p415_p9), 2475754826  }
  0x14   : > { %v1178_v22 = vmov (!%p415_p9), 2131351028   ;;  %v1179_v25 = vmov (!%p415_p9), 2102212464   ;;  %v1180_v28 = vmov (!%p415_p9), 920167782  }
  0x15   : > { %v1181_v31 = vmov (!%p415_p9), 1326507024   ;;  %s1490_s1 = sld [smem:[#allocation8_spill]] (!%p415_p9)  ;;  %s456_s27 = sand.u32 (!%p415_p9), 1, %s1165_s30  }
  0x16   : > { %s979_s28 = sshll.u32 (!%p415_p9), %s456_s27, 3  ;;  %s1001_s22 = sshll.u32 (!%p415_p9), %s1289_s17, 7 }
  0x19   : > { %v987_v2 = vld [vmem:[%s1489_s2] ss:$0 sm:$0xff] (!%p415_p9)  ;;  %s1422_s2 = scalar_lea.hbm (!%p415_p9), %s1479_s14, %s1001_s22 }
  0x1a   : > { %s460_s25 = scalar_select %p459_p10, %s1289_s17, 1 }
  0x1c   : > { %s980_s26 = sshll.u32 %s460_s25, 3  ;;  %s458_s25 = scalar_lea.vmem [#allocation2], %s979_s28 }
  0x1d   : > { %s462_s18 = scalar_lea.vmem %s1488_s0, %s980_s26  ;;  %s1191_s26 = smov 32  }
  0x1e   : > { %v1321_v1 = vld [vmem:[%s462_s18] sm:$0xff]  ;;  %s903_s18 = scalar_lea.sflag [#allocation3], %s456_s27  ;;  %s1192_s28 = smov [#allocation2]  }
  0x1f   : > { %594 = vperm.xlu0 %1095, %v1321_v1   ;;  %s1115_s20 = sshll.u32 %s1192_s28, 4  ;;  %s1116_s20 = int_to_ptr.vmem [resolvable:$false] %s1115_s20 }
  0x20   : > { %s1117_s0 = scalar_lea.vmem %s1116_s20, 256 }
  0x9e   : > { %v595_v4 = vpop.permute.xlu0 %594 }
  0x9f   : > { %v603_v5 = vmul.f32 %v987_v2, %v595_v4 }
  0xa1   : > { %v1330_v6 = vadd.f32 %v988_v3, %v603_v5 }
  0xa3   : > { %v617_v7 = vand.u32 2139095040, %v1330_v6  ;;  %v614_v11 = vand.u32 2147483647, %v1330_v6  ;;  %vm616_vm7 = vcmp.lt.s32.totalorder %v1330_v6, 0  ;;  %vm706_vm14 = vweird.f32 %v1330_v6 }
  0xa5   : > { %v618_v8 = vshrl.u32 %v617_v7, 23  ;;  %v621_v15 = vand.u32 8388607, %v614_v11  ;;  %vm615_vm8 = vcmp.le.f32.partialorder %v614_v11, 0.7853982 }
  0xa7   : > { %v989_v9 = vadd.s32 4294967169, %v618_v8  ;;  %v622_v33 = vor.u32 8388608, %v621_v15 }
  0xa9   : > { %v624_v10 = vadd.s32 1, %v989_v9  ;;  %v662_v47 = vshll.u32 %v622_v33, 8 }
  0xab   : > { %vm625_vm0 = vcmp.gt.s32.totalorder %v624_v10, 0 }
  0xac   : > { %v626_v12 = vsel %vm625_vm0, %v624_v10, 0  ;;  %vm1185_vm0 = vmmov 0  }
  0xad   : > { %v628_v13 = vand.u32 31, %v626_v12  ;;  %v627_v16 = vshrl.u32 %v626_v12, 5 }
  0xaf   : > { %v629_v14 = vsub.s32 32, %v628_v13  ;;  %v631_v18 = vshll.u32 %v1176_v17, %v628_v13  ;;  %v634_v20 = vshll.u32 %v1177_v19, %v628_v13  ;;  %v637_v24 = vshll.u32 %v1178_v22, %v628_v13 }
  0xb0   : > { %v640_v27 = vshll.u32 %v1179_v25, %v628_v13  ;;  %v643_v30 = vshll.u32 %v1180_v28, %v628_v13  ;;  %vm646_vm1 = vcmp.lt.s32.totalorder %v627_v16, 1  ;;  %vm649_vm2 = vcmp.lt.s32.totalorder %v627_v16, 4 }
  0xb1   : > { %v632_v21 = vshrl.u32 %v1177_v19, %v629_v14  ;;  %v635_v23 = vshrl.u32 %v1178_v22, %v629_v14  ;;  %v638_v26 = vshrl.u32 %v1179_v25, %v629_v14  ;;  %v641_v29 = vshrl.u32 %v1180_v28, %v629_v14 }
  0xb2   : > { %v644_v32 = vshrl.u32 %v1181_v31, %v629_v14  ;;  %v630_v42 = vshrl.u32 %v1176_v17, %v629_v14  ;;  %vm648_vm3 = vcmp.lt.s32.totalorder %v627_v16, 3  ;;  %vm647_vm4 = vcmp.lt.s32.totalorder %v627_v16, 2 }
  0xb3   : > { %v633_v34 = vor.u32 %v632_v21, %v631_v18  ;;  %v636_v35 = vor.u32 %v635_v23, %v634_v20  ;;  %v639_v36 = vor.u32 %v638_v26, %v637_v24  ;;  %v642_v37 = vor.u32 %v641_v29, %v640_v27  ;;  %v612_v27 = vld [vmem:[%s1469_s4] sm:$0x1] }
  0xb4   : > { %v645_v38 = vor.u32 %v644_v32, %v643_v30  ;;  %v509_v23 = vlaneseq  ;;  %vm613_vm9 = vcmp.gt.f32.partialorder %v612_v27, 0.5  ;;  %v1182_v32 = vmov 0  }
  0xb5   : > { %v651_v39 = vsel %vm649_vm2, %v639_v36, 2102212464  ;;  %v654_v40 = vsel %vm646_vm1, %v633_v34, %v636_v35  ;;  %v658_v41 = vsel %vm646_vm1, %v636_v35, %v639_v36  ;;  %v655_v43 = vsel %vm649_vm2, %v642_v37, 920167782 }
  0xb6   : > { %v659_v44 = vsel %vm649_vm2, %v645_v38, 1326507024  ;;  %v656_v45 = vsel %vm648_vm3, %v639_v36, %v655_v43  ;;  %v650_v48 = vsel %vm646_vm1, %v630_v42, %v633_v34  ;;  %v652_v49 = vsel %vm648_vm3, %v636_v35, %v651_v39 }
  0xb7   : > { %v660_v46 = vsel %vm648_vm3, %v642_v37, %v659_v44  ;;  %v657_v50 = vsel %vm647_vm4, %v654_v40, %v656_v45  ;;  %v653_v56 = vsel %vm647_vm4, %v650_v48, %v652_v49  ;;  %v720_v29 = vshrl.u32 %v509_v23, 7 }
  0xb8   : > { %v661_v51 = vsel %vm647_vm4, %v658_v41, %v660_v46  ;;  %v1339_v54 = vmul.u32.u64.low %v662_v47, %v657_v50  ;;  %v1340_v55 = vmul.u32.u64.high %v662_v47, %v657_v50, %v1339_v54  ;;  %v669_v58 = vmul.u32 %v662_v47, %v653_v56  ;;  %v759_v56 = vld [vmem:[%s1472_s7 + $0x10] sm:$0xff] }
  0xb9   : > { %v1336_v52 = vmul.u32.u64.low %v662_v47, %v661_v51  ;;  %v1337_v53 = vmul.u32.u64.high %v662_v47, %v661_v51, %v1336_v52  ;;  %v721_v31 = vsub.s32 0, %v720_v29  ;;  %v718_v33 = vsel %vm613_vm9, 1, %v1182_v32  ;;  %v984_v29 = vld [vmem:[%s1490_s1 + $0x3] ss:$0 sm:$0xff] }
  0xba   : > { %v672_v57 = vadd.s32 1, %v1340_v55  ;;  %v1183_v45 = vmov 6   ;;  %v1033_v51 = vtrunc.f32 %v1321_v1  ;;  %vm518_vm1 = vcmask 64512  }
  0xbb   : > { %vm671_vm5 = vc.u32 %v1337_v53, %v1339_v54  ;;  %v670_v8 = vadd.s32 %v1339_v54, %v1337_v53  ;;  %v722_v35 = vrot.slane %v718_v33, %v721_v31  ;;  %1096 = vset.pattern.permute.xlu1 %v1183_v45  ;;  %v1184_v53 = vmov 0.0   ;;  %v757_v54 = vld [vmem:[%s1472_s7] sm:$0xff] }
  0xbc   : > { %v673_v59 = vsel %vm671_vm5, %v672_v57, %v1340_v55  ;;  %v1034_v52 = vcvt.f32.s32 %v1033_v51  ;;  %1011 = vmatprep.subr.mxu0 %v1184_v53  ;;  %1013 = vmatprep.mubr.msk.f32.mxu0 %vm1185_vm0, %v1184_v53  ;;  %v758_v55 = vld [vmem:[%s1472_s7 + $0x8] sm:$0xff]  ;;  %v1186_v57 = vmov 0.0|0.0   ;;  %vm900_vm3 = vcmask 392448  }
  0xbd   : > { %v674_v60 = vadd.s32 %v673_v59, %v669_v58  ;;  %vm723_vm13 = vcmp.eq.s32.totalorder %v722_v35, 1  ;;  %1027 = vmatprep.subr.bf16.mxu1 %v1186_v57  ;;  %v1028_v58 = vpack.c.bf16 %v758_v55, %v757_v54  ;;  %v760_v59 = vld [vmem:[%s1472_s7 + $0x18] sm:$0xff]  ;;  %1024 = vmatprep.mubr.msk.f32.mxu1 %vm1185_vm0, %v1184_v53  ;;  %v996_v35 = vld [vmem:[%s1473_s8] ss:$0 sm:$0xff] }
  0xbe   : > { %v997_v55 = vld [vmem:[%s1474_s9] ss:$0 sm:$0xff] }
  0xbf   : > { %v675_v61 = vadd.s32 536870912, %v674_v60  ;;  %1029 = vmatpush3.bf16.msra.mxu1 %v1028_v58 }
  0xc0   : > { %1030 = vmatprep.subr.bf16.mxu1 %v1186_v57  ;;  %v998_v57 = vld [vmem:[%s1475_s10] ss:$0 sm:$0xff] }
  0xc1   : > { %v676_v62 = vshrl.u32 %v675_v61, 30  ;;  %v1187_v61 = vmov 1  }
  0xc3   : > { %v677_v63 = vshll.u32 %v676_v62, 30  ;;  %v700_v21 = vsub.s32 4, %v676_v62 }
  0xc5   : > { %v678_v0 = vsub.s32 %v674_v60, %v677_v63  ;;  %v701_v25 = vsel %vm616_vm7, %v700_v21, %v676_v62  ;;  %v1031_v60 = vpack.c.bf16 %v760_v59, %v759_v56  ;;  %v1188_v62 = vmov 2  }
  0xc6   : > { %v703_v28 = vsel %vm615_vm8, 0, %v701_v25  ;;  %v1189_v63 = vmov 3   ;;  %v983_v25 = vld [vmem:[%s1490_s1 + $0x2] ss:$0 sm:$0xff] }
  0xc7   : > { %v680_v2 = vsub.s32 0, %v678_v0  ;;  %v707_v30 = vadd.s32 3, %v703_v28  ;;  %1032 = vmatpush3.bf16.msra.mxu1 %v1031_v60 }
  0xc9   : > { %v990_v3 = vmin.u32 %v680_v2, %v678_v0  ;;  %v708_v34 = vand.u32 3, %v707_v30 }
  0xcb   : > { %v682_v4 = vclz %v990_v3  ;;  %vm713_vm10 = vcmp.eq.s32.totalorder %v708_v34, 2  ;;  %vm710_vm11 = vcmp.eq.s32.totalorder %v708_v34, 0  ;;  %vm709_vm12 = vcmp.lt.s32.totalorder %v708_v34, 2 }
  0xcc   : > { %v510_v3 = vand.u32 127, %v509_v23 }
  0xcd   : > { %v991_v5 = vadd.s32 4294967294, %v682_v4 }
  0xcf   : > { %vm992_vm6 = vcmp.lt.s32.totalorder %v991_v5, 0 }
  0xd0   : > { %v685_v7 = vsel %vm992_vm6, 0, %v991_v5 }
  0xd1   : > { %v686_v9 = vsub.s32 32, %v685_v7  ;;  %v690_v10 = vsub.s32 4294967266, %v685_v7  ;;  %v687_v12 = vshll.u32 %v678_v0, %v685_v7 }
  0xd3   : > { %v688_v13 = vshrl.u32 %v670_v8, %v686_v9  ;;  %v691_v14 = vadd.s32 127, %v690_v10  ;;  %v993_v9 = vld [vmem:[%s1470_s5] ss:$0 sm:$0xff] }
  0xd5   : > { %v689_v15 = vor.u32 %v688_v13, %v687_v12  ;;  %v692_v16 = vshll.u32 %v691_v14, 23  ;;  %v994_v12 = vld [vmem:[%s1471_s6] ss:$0 sm:$0xff] }
  0xd7   : > { %v693_v17 = vor.u32 4788187, %v692_v16  ;;  %v696_v19 = vcvt.s32.f32 %v689_v15  ;;  %v1190_v16 = vmov 5  }
  0xd8   : > { %1102 = vset.pattern.permute.xlu0 %v1190_v16 }
  0xd9   : > { %v694_v18 = vand.u32 2147483647, %v693_v17 }
  0xdb   : > { %v697_v20 = vmul.f32 %v696_v19, %v694_v18  ;;  %v981_v19 = vld [vmem:[%s1490_s1] ss:$0 sm:$0xff] }
  0xdd   : > { %v698_v22 = vxor.u32 2147483648, %v697_v20 }
  0xdf   : > { %v699_v24 = vsel %vm616_vm7, %v698_v22, %v697_v20  ;;  %v982_v20 = vld [vmem:[%s1490_s1 + $0x1] ss:$0 sm:$0xff] }
  0xe0   : > { %v702_v26 = vsel %vm615_vm8, %v1330_v6, %v699_v24 }
  0xe1   : > { %1103 = vcosq.f32 %v702_v26 }
  0xe2   : > { %1105 = vsinq.f32 %v702_v26 }
  0xeb   : > { %v1104_v11 = vpop.eup %1103 }
  0xec   : > { %v1106_v36 = vpop.eup %1105  ;;  %v714_v37 = vxor.u32 2147483648, %v1104_v11 }
  0xed   : > { %v711_v38 = vxor.u32 2147483648, %v1106_v36 }
  0xee   : > { %v715_v39 = vsel %vm713_vm10, %v714_v37, %v1106_v36 }
  0xef   : > { %v712_v40 = vsel %vm710_vm11, %v1104_v11, %v711_v38 }
  0xf0   : > { %v716_v41 = vsel %vm709_vm12, %v712_v40, %v715_v39  ;;  %v882_v40 = vsub.f32 1.0, %v1321_v1 }
  0xf1   : > { %v717_v42 = vsel %vm706_vm14, nan, %v716_v41 }
  0xf2   : > { %v724_v43 = vsel %vm723_vm13, %v1330_v6, %v717_v42  ;;  %v517_v6 = vld [vmem:[%s1476_s11] sm:$0xff] }
  0xf3   : > { %v728_v44 = vsel %vm727_vm15, %v724_v43, 0.0  ;;  %1012 = vmatpush3.msra.mxu0 %v517_v6 }
  0xf4   : > { %729 = vadd.xlane.f32.xlu0 %v728_v44 }
 0x181   : > { %v730_v46 = vpop.xlane.xlu0 %729 }
 0x182   : > { %v732_v47 = vmul.f32 0.03125, %v730_v46  ;;  %v999_v46 = vld [vmem:[%s1478_s13] ss:$0 sm:$0xff] }
 0x184   : > { %v733_v48 = vsub.f32 %v724_v43, %v732_v47 }
 0x186   : > { %v734_v49 = vmul.f32 %v733_v48, %v733_v48 }
 0x188   : > { %v735_v50 = vsel %vm727_vm15, %v734_v49, 0.0 }
 0x189   : > { %736 = vadd.xlane.f32.xlu1 %v735_v50 }
 0x19a   : > { %512 = vperm.xlu1 %1096, %v1034_v52  }
 0x19e   : > { %1097 = vset.pattern.permute.xlu1 %v1182_v32 }
 0x19f   : > { %468 = vperm.xlu1 %1097, %v1321_v1  }
 0x1a3   : > { %1098 = vset.pattern.permute.xlu1 %v1187_v61 }
 0x1a4   : > { %478 = vperm.xlu1 %1098, %v1321_v1  }
 0x1a8   : > { %1099 = vset.pattern.permute.xlu1 %v1188_v62 }
 0x1a9   : > { %489 = vperm.xlu1 %1099, %v1321_v1  }
 0x1ad   : > { %1100 = vset.pattern.permute.xlu1 %v1189_v63 }
 0x1ae   : > { %500 = vperm.xlu1 %1100, %v1321_v1  }
 0x1b2   : > { %1101 = vset.pattern.permute.xlu1 %v1190_v16 }
 0x1b3   : > { %877 = vperm.xlu1 %1101, %v1321_v1  }
 0x216   : > { %v737_v0 = vpop.xlane.xlu1 %736 }
 0x217   : > { %v738_v2 = vmul.f32 0.03125, %v737_v0 }
 0x219   : > { %v739_v4 = vadd.f32 1e-05, %v738_v2 }
 0x21a   : > { %v513_v5 = vpop.permute.xlu1 %512 }
 0x21b   : > { %1107 = vrsqrt.f32 %v739_v4  ;;  %vm514_vm2 = vcmp.eq.s32.totalorder %v513_v5, %v510_v3 }
 0x21c   : > { %v985_v7 = vsel %vm514_vm2, 1.0, %v1184_v53 }
 0x21d   : > { %1014 = vmatmul.mubr.msk.f32.vlgmr.msra.gmra.mrb[0].mxu0 %vm518_vm1, %v985_v7 }
 0x21e   : > { %v469_v17 = vpop.permute.xlu1 %468 }
 0x21f   : > { %v475_v22 = vmul.f32 %v981_v19, %v469_v17 }
 0x223   : > { %v479_v18 = vpop.permute.xlu1 %478 }
 0x224   : > { %v485_v23 = vmul.f32 %v982_v20, %v479_v18 }
 0x225   : > { %v1108_v8 = vpop.eup %1107 }
 0x226   : > { %v741_v10 = vmul.f32 %v1108_v8, %v733_v48  ;;  %v486_v27 = vadd.f32 %v485_v23, %v475_v22  ;;  %v875_v48 = vld [vmem:[%s1477_s12] sm:$0xff] }
 0x228   : > { %v748_v13 = vmul.f32 %v993_v9, %v741_v10  ;;  %v490_v21 = vpop.permute.xlu1 %489 }
 0x229   : > { %v496_v28 = vmul.f32 %v983_v25, %v490_v21 }
 0x22a   : > { %v755_v14 = vadd.f32 %v994_v12, %v748_v13 }
 0x22b   : > { %v497_v31 = vadd.f32 %v496_v28, %v486_v27 }
 0x22c   : > { %v756_v15 = vmax.f32 %v755_v14, 0.0 }
 0x22d   : > { %v501_v30 = vpop.permute.xlu1 %500 }
 0x22e   : > { %1025 = vmatmul.mubr.msk.f32.vlgmr.msra.gmra.mrb[0].mxu1 %vm727_vm15, %v756_v15  ;;  %v507_v32 = vmul.f32 %v984_v29, %v501_v30 }
 0x230   : > { %v508_v33 = vadd.f32 %v507_v32, %v497_v31 }
 0x232   : > { %v878_v49 = vpop.permute.xlu1 %877 }
 0x233   : > { %v880_v50 = vmul.f32 %v878_v49, %v875_v48 }
 0x2f0   : > { %v588_v24 = vpop.f32.mrb[0].mxu0 }
 0x2f1   : > { %v1015_v26 = vpop.f32.mrb[1].mxu0  ;;  %v834_v34 = vadd.f32 %v588_v24, %v508_v33 }
 0x301   : > { %v830_v11 = vpop.f32.mrb[0].mxu1 }
 0x302   : > { %v835_v36 = vadd.f32 %v834_v34, %v830_v11  ;;  %v1026_v37 = vpop.f32.mrb[1].mxu1 }
 0x304   : > { %v843_v38 = vadd.f32 %v996_v35, %v835_v36 }
 0x306   : > { %v846_v39 = vsel %vm727_vm15, %v843_v38, 0.0 }
 0x307   : > { %847 = vadd.xlane.f32.xlu0 %v846_v39 }
 0x31d   : > { %891 = vperm.xlu0 %1102, %v882_v40  }
 0x394   : > { %v848_v41 = vpop.xlane.xlu0 %847 }
 0x395   : > { %v849_v42 = vmul.f32 0.03125, %v848_v41 }
 0x397   : > { %v850_v43 = vsub.f32 %v843_v38, %v849_v42 }
 0x399   : > { %v851_v44 = vmul.f32 %v850_v43, %v850_v43 }
 0x39b   : > { %v852_v45 = vsel %vm727_vm15, %v851_v44, 0.0 }
 0x39c   : > { %853 = vadd.xlane.f32.xlu1 %v852_v45  ;;  %v892_v47 = vpop.permute.xlu0 %891 }
 0x39d   : > { %v894_v1 = vmul.f32 %v999_v46, %v892_v47 }
 0x39f   : > { %v895_v51 = vadd.f32 %v894_v1, %v880_v50 }
 0x3ad   : > { %897 = vrot.lane.b32.xlu1 %v895_v51, %s1191_s26  ;;  %s916_s26 = sshll.u32 %s458_s25, 4  ;;  %s1424_s26 = int_to_ptr.vmem [resolvable:$true] %s916_s26 }
 0x3ae   : > { %s1111_s17 = scalar_lea.vmem %s1424_s26, 128  ;;  %p1118_p0 = scmp.lt.s32.totalorder %s1424_s26, %s1116_s20 }
 0x3af   : > { %p1112_p11 = scmp.ne.s32.totalorder %s1424_s26, %s1111_s17  ;;  %p1119_p1 = scmp.lt.s32.totalorder %s1117_s0, %s1111_s17 }
 0x3b1   : > { %p1113_p12 = pnand %p1112_p11, %p1306_p5  ;;  %p1120_p2 = por %p1119_p1, %p1118_p0 }
 0x3b3   : > { %p1114_p13 = pneg %p1113_p12 }
 0x3b5   : > { %p1121_p3 = pnand %p1120_p2, %p1114_p13 }
 0x429   : > { %v854_v52 = vpop.xlane.xlu1 %853 }
 0x42a   : > { %v855_v53 = vmul.f32 0.03125, %v854_v52 }
 0x42c   : > { %v856_v6 = vadd.f32 1e-05, %v855_v53 }
 0x42d   : > { %v898_v60 = vpop.permute.xlu1 %897 }
 0x42e   : > { %1109 = vrsqrt.f32 %v856_v6 }
 0x438   : > { %v1110_v54 = vpop.eup %1109 }
 0x439   : > { %v858_v56 = vmul.f32 %v1110_v54, %v850_v43 }
 0x43b   : > { %v865_v58 = vmul.f32 %v997_v55, %v858_v56 }
 0x43d   : > { %v872_v59 = vadd.f32 %v998_v57, %v865_v58 }
 0x43f   : > { %v873_v61 = vmax.f32 %v872_v59, 0.0 }
 0x441   : > { %874 = vst.msk [vmem:[%s458_s25] sm:$0xff] %vm727_vm15, %v873_v61 }
 0x442   : > { %901 = vst.msk [vmem:[%s458_s25] sm:$0xff] %vm900_vm3, %v898_v60 }
 0x443   : > { %1124 = shalt.err (!%p1121_p3)
}
 0x444   : > { %s1125_s1 = scalar_lea.hbm %s1422_s2, 128  ;;  %s1129_s15 = scalar_lea.hbm %s1479_s14, 256 }
 0x445   : > { %p1126_p4 = scmp.ne.s32.totalorder %s1422_s2, %s1125_s1  ;;  %p1130_p9 = scmp.lt.u32.totalorder %s1422_s2, %s1479_s14 }
 0x446   : > { %p1131_p10 = scmp.lt.u32.totalorder %s1129_s15, %s1125_s1  ;;  %p1133_p12 = scmp.lt.u32.totalorder %s1125_s1, %s1422_s2 }
 0x447   : > { %p1127_p7 = pnand %p1126_p4, %p1306_p5 }
 0x448   : > { %p1132_p11 = por %p1131_p10, %p1130_p9 }
 0x449   : > { %p1128_p8 = pneg %p1127_p7 }
 0x44a   : > { %p1134_p13 = por %p1133_p12, %p1132_p11 }
 0x44c   : > { %p1135_p0 = pnand %p1134_p13, %p1128_p8 }
 0x44e   : > { %1138 = shalt.err (!%p1135_p0)
}
 0x44f   : > { %1039 = dma.vmem_to_hbm [thread:$0]  (%p1306_p5), %s1424_s26, 128, %s1422_s2, %s903_s18  }
 0x450 PF: > { %p1045_p1 = scmp.ge.s32.totalorder %s1173_s16, 2  ;;  %s928_s17 = sand.u32 1, %s1161_s29  }
 0x451   : > { %s929_s28 = scalar_lea.sflag [#allocation3], %s928_s17 }
 0x452   : > { %p1042_p2 = pnand %p1045_p1, %p1310_p6 }
 0x454   : > { %1156 = dma.done.wait (!%p1042_p2), %s929_s28, 128  }
 0x455   : > { %1158 = vsyncadd (!%p1042_p2), %s929_s28, 4294967168  ;;  %s1491_s20 = sld [smem:[#allocation5_spill]]  ;;  %s1492_s15 = sld [smem:[#allocation6_spill]] }
 0x456   : > { %p24_p3 = scmp.ge.s32.totalorder %s1293_s19, 4   ;;  %s1493_s29 = smov %s1165_s30 }
 0x457   : > { %s1495_s16 = smov %s1293_s19 }
 0x458   :  { %26 = sbr.rel (!%p24_p3) target bundleno = 7 (0x7), region = 111 }
 0x45b   : > { %s1494_s30 = smov %s1491_s20 }
 0x45f   :  { %934 = vsyncpa [#allocation3], 1 }
 0x460   :  { %936 = vsyncpa [#allocation3 + $0x1], 1 }

</bundles_post_ra>
